<compile_context>
chip_gen: v5e
topology: v5e:2x2
jax: 0.10.0
libtpu: 0.0.40
codegen_flags: <defaults>
</compile_context>

<pallas_src>
import jax
import jax.numpy as jnp
from jax import lax
from jax.experimental import pallas as pl
from jax.experimental.pallas import tpu as pltpu


def _round_up(x, m):
    return (x + m - 1) // m * m


def _interleaved_linear_kernel(w_ref, b_ref, x_ref, o_ref):
    """y = W x + b computed in the lane-interleaved layout.

    x_ref/o_ref: [block_rows, 128] f32.  Even lanes carry feature 0, odd lanes
                 carry feature 1 (exactly how row-major [N, 2] f32 lays out).
    w_ref: SMEM f32[4] = [w00, w01, w10, w11]  (PyTorch weight, flattened)
    b_ref: SMEM f32[2] = [b0, b1]
    """
    v = x_ref[...]                                    # [br, 128]
    nl = v.shape[-1]                                  # 128 (static)

    lane = lax.broadcasted_iota(jnp.int32, (1, nl), 1)
    even = (lane & 1) == 0                            # [1, 128] lane-parity mask

    w00 = w_ref[0]
    w01 = w_ref[1]
    w10 = w_ref[2]
    w11 = w_ref[3]
    b0 = b_ref[0]
    b1 = b_ref[1]

    # Per-lane coefficients: even lanes produce y0, odd lanes produce y1.
    a = jnp.where(even, w00, w11)                     # multiplies this lane's value
    c = jnp.where(even, w01, w10)                     # multiplies the partner lane
    bias = jnp.where(even, b0, b1)

    # Partner lane: lane 2j needs lane 2j+1 (roll by -1 == nl-1), lane 2j+1
    # needs lane 2j (roll by +1).  Both rolls run on the XLU slot.
    partner = jnp.where(even,
                        pltpu.roll(v, shift=nl - 1, axis=1),
                        pltpu.roll(v, shift=1, axis=1))

    # Single fused store per tile.
    o_ref[...] = (a * v + c * partner + bias).astype(o_ref.dtype)


def linear_pallas(x, weight, bias, *, block_rows=4096):
    """y = x @ weight.T + bias  (PyTorch nn.Linear(2, 2) semantics).

    x:      [N, 2]  float32
    weight: [2, 2]  float32  (PyTorch layout: weight[out, in])
    bias:   [2]     float32
    """
    assert x.dtype == jnp.float32, "kernel assumes float32 activations"
    n, f_in = x.shape
    f_out, f_in_w = weight.shape
    assert f_in == 2 and f_out == 2 and f_in_w == 2
    assert block_rows % 8 == 0, "block_rows must be a multiple of 8 (sublane tile)"

    # Row-major [N, 2] f32 is feature-interleaved; pad the row count (only when
    # needed) to a multiple of 64 so the flat buffer reshapes to [r, 128].
    n_pad = _round_up(n, 64)
    if n_pad != n:
        x = jnp.pad(x, ((0, n_pad - n), (0, 0)))
    r = n_pad // 64
    xi = x.reshape(r, 128)                            # free, contiguous view

    w_flat = weight.reshape(-1).astype(jnp.float32)   # [4]
    b_flat = bias.reshape(-1).astype(jnp.float32)     # [2]

    block_r = min(block_rows, r)                      # full-dim block for small N
    grid = (pl.cdiv(r, block_r),)                     # ragged last block -> masked

    yi = pl.pallas_call(
        _interleaved_linear_kernel,
        out_shape=jax.ShapeDtypeStruct((r, 128), x.dtype),
        grid=grid,
        in_specs=[
            pl.BlockSpec(memory_space=pltpu.MemorySpace.SMEM),   # weight scalars
            pl.BlockSpec(memory_space=pltpu.MemorySpace.SMEM),   # bias scalars
            pl.BlockSpec((block_r, 128), lambda i: (i, 0)),      # interleaved x
        ],
        out_specs=pl.BlockSpec((block_r, 128), lambda i: (i, 0)),
        compiler_params=pltpu.CompilerParams(
            dimension_semantics=("parallel",),        # v7x: split grid across 2 TCs
        ),
    )(w_flat, b_flat, xi)

    y = yi.reshape(n_pad, 2)
    if n_pad != n:
        y = y[:n]
    return y


def linear_ref(x, weight, bias):
    """Exact f32 elementwise reference (avoids MXU precision ambiguity)."""
    y0 = x[:, 0] * weight[0, 0] + x[:, 1] * weight[0, 1] + bias[0]
    y1 = x[:, 0] * weight[1, 0] + x[:, 1] * weight[1, 1] + bias[1]
    return jnp.stack([y0, y1], axis=-1)


def init_params(key, f_in=2, f_out=2):
    """Deterministic init mimicking nn.Linear defaults (uniform +/- 1/sqrt(fan_in))."""
    kw, kb = jax.random.split(key)
    bound = 1.0 / jnp.sqrt(jnp.float32(f_in))
    weight = jax.random.uniform(kw, (f_out, f_in), jnp.float32, -bound, bound)
    bias = jax.random.uniform(kb, (f_out,), jnp.float32, -bound, bound)
    return weight, bias


if __name__ == "__main__":
    key = jax.random.PRNGKey(0)
    k_x, k_p, k_big = jax.random.split(key, 3)

    weight, bias = init_params(k_p)

    # Small batch implied by the module: Linear(2, 2) -> x is [batch, 2].
    x = jax.random.normal(k_x, (8, 2), jnp.float32)
    y = jax.block_until_ready(linear_pallas(x, weight, bias))
    y_ref = linear_ref(x, weight, bias)
    assert y.shape == (8, 2)
    assert jnp.allclose(y, y_ref, atol=1e-5, rtol=1e-5), "mismatch (small batch)"

    # Exercise the multi-step grid, the ragged last block and the row padding.
    x_big = jax.random.normal(k_big, (262_145, 2), jnp.float32)
    y_big = jax.block_until_ready(linear_pallas(x_big, weight, bias))
    y_big_ref = linear_ref(x_big, weight, bias)
    assert y_big.shape == (262_145, 2)
    assert jnp.allclose(y_big, y_big_ref, atol=1e-5, rtol=1e-5), "mismatch (tiled batch)"

    print("KERNEL_OK")
</pallas_src>

<mosaic_0001>
module attributes {stable_mosaic.version = 11 : i64} {
  func.func @_interleaved_linear_kernel(%arg0: i32, %arg1: memref<4xf32, #tpu.memory_space<smem>>, %arg2: memref<2xf32, #tpu.memory_space<smem>>, %arg3: memref<1x128xf32, #tpu.memory_space<vmem>>, %arg4: memref<1x128xf32, #tpu.memory_space<vmem>>) attributes {dimension_semantics = [#tpu.dimension_semantics<parallel>], iteration_bounds = array<i64: 1>, scalar_prefetch = 0 : i64, scratch_operands = 0 : i64, tpu.core_type = #tpu.core_type<tc>, window_params = [{transform_indices = @transform_0, window_bounds = array<i64: 4>}, {transform_indices = @transform_1, window_bounds = array<i64: 2>}, {transform_indices = @transform_2, window_bounds = array<i64: 1, 128>}, {transform_indices = @transform_3, window_bounds = array<i64: 1, 128>}]} {
    %c0 = arith.constant 0 : index
    %c0_0 = arith.constant 0 : index
    %0 = vector.load %arg3[%c0, %c0_0] : memref<1x128xf32, #tpu.memory_space<vmem>>, vector<1x128xf32>
    %1 = tpu.iota {dimensions = array<i32: 1>} : vector<1x128xi32>
    %c1_i32 = arith.constant 1 : i32
    %2 = vector.broadcast %c1_i32 : i32 to vector<1x128xi32>
    %3 = arith.andi %1, %2 : vector<1x128xi32>
    %c0_i32 = arith.constant 0 : i32
    %4 = vector.broadcast %c0_i32 : i32 to vector<1x128xi32>
    %5 = arith.cmpi eq, %3, %4 : vector<1x128xi32>
    %c0_1 = arith.constant 0 : index
    %6 = memref.load %arg1[%c0_1] : memref<4xf32, #tpu.memory_space<smem>>
    %c1 = arith.constant 1 : index
    %7 = memref.load %arg1[%c1] : memref<4xf32, #tpu.memory_space<smem>>
    %c2 = arith.constant 2 : index
    %8 = memref.load %arg1[%c2] : memref<4xf32, #tpu.memory_space<smem>>
    %c3 = arith.constant 3 : index
    %9 = memref.load %arg1[%c3] : memref<4xf32, #tpu.memory_space<smem>>
    %c0_2 = arith.constant 0 : index
    %10 = memref.load %arg2[%c0_2] : memref<2xf32, #tpu.memory_space<smem>>
    %c1_3 = arith.constant 1 : index
    %11 = memref.load %arg2[%c1_3] : memref<2xf32, #tpu.memory_space<smem>>
    %12 = vector.broadcast %6 : f32 to vector<1x128xf32>
    %13 = vector.broadcast %9 : f32 to vector<1x128xf32>
    %14 = arith.select %5, %12, %13 : vector<1x128xi1>, vector<1x128xf32>
    %15 = vector.broadcast %7 : f32 to vector<1x128xf32>
    %16 = vector.broadcast %8 : f32 to vector<1x128xf32>
    %17 = arith.select %5, %15, %16 : vector<1x128xi1>, vector<1x128xf32>
    %18 = vector.broadcast %10 : f32 to vector<1x128xf32>
    %19 = vector.broadcast %11 : f32 to vector<1x128xf32>
    %20 = arith.select %5, %18, %19 : vector<1x128xi1>, vector<1x128xf32>
    %c127_i32 = arith.constant 127 : i32
    %21 = tpu.dynamic_rotate %0 by %c127_i32 dim 1 : vector<1x128xf32>, i32 -> vector<1x128xf32>
    %c1_i32_4 = arith.constant 1 : i32
    %22 = tpu.dynamic_rotate %0 by %c1_i32_4 dim 1 : vector<1x128xf32>, i32 -> vector<1x128xf32>
    %23 = arith.select %5, %21, %22 : vector<1x128xi1>, vector<1x128xf32>
    %24 = arith.mulf %14, %0 : vector<1x128xf32>
    %25 = arith.mulf %17, %23 : vector<1x128xf32>
    %26 = arith.addf %24, %25 : vector<1x128xf32>
    %27 = arith.addf %26, %20 : vector<1x128xf32>
    %c0_5 = arith.constant 0 : index
    %c0_6 = arith.constant 0 : index
    %28 = vector.load %arg4[%c0_5, %c0_6] : memref<1x128xf32, #tpu.memory_space<vmem>>, vector<1x128xf32>
    tpu.vector_store %arg4[%c0_5, %c0_6], %27 {strides = array<i32>} : memref<1x128xf32, #tpu.memory_space<vmem>>, vector<1x128xf32>,
    return
  }
  func.func @transform_0(%arg0: i32) -> i32 {
    %c0_i32 = arith.constant 0 : i32
    %c0_i32_0 = arith.constant 0 : i32
    return %c0_i32 : i32
  }
  func.func @transform_1(%arg0: i32) -> i32 {
    %c0_i32 = arith.constant 0 : i32
    %c0_i32_0 = arith.constant 0 : i32
    return %c0_i32 : i32
  }
  func.func @transform_2(%arg0: i32) -> (i32, i32) {
    %c0_i32 = arith.constant 0 : i32
    %c0_i32_0 = arith.constant 0 : i32
    return %arg0, %c0_i32 : i32, i32
  }
  func.func @transform_3(%arg0: i32) -> (i32, i32) {
    %c0_i32 = arith.constant 0 : i32
    %c0_i32_0 = arith.constant 0 : i32
    return %arg0, %c0_i32 : i32, i32
  }
}

</mosaic_0001>

<bundles_post_ra>
// kernel: tpu_custom_call.1
= control target key start
LH: loop header
LB: loop body
LE: loop exit
PB: predicated region body
PF: predicated region fallthrough
CT: control target
= control target key end

     0   :  { %8 = vsyncpa [#allocation4], 0  ;;  %s188_s0 = inlined_call_operand.hbm [shape: f32[4], index: 0, kind: input, shape index: {}]   ;;  %s189_s1 = inlined_call_operand.hbm [shape: f32[2], index: 1, kind: input, shape index: {}]   ;;  %s190_s2 = inlined_call_operand.vmem [shape: f32[1,128], index: 2, kind: input, shape index: {}]   ;;  %s191_s3 = inlined_call_operand.hbm [shape: f32[1,128], index: 3, kind: output, shape index: {}]  }
   0x1   :  { %9 = vsyncpa [#allocation6], 0 }
   0x2   :  { %10 = vsyncpa [#allocation3], 0  ;;  %s16_s14 = sshll.u32 %s188_s0, 4  ;;  %s25_s17 = sshll.u32 %s189_s1, 4  ;;  %s17_s14 = int_to_ptr.hbm [resolvable:$true] %s16_s14  ;;  %s26_s17 = int_to_ptr.hbm [resolvable:$true] %s25_s17 }
   0x3   :  { %s151_s18 = smov [#allocation2]   ;;  %s152_s19 = smov [#allocation5]  }
   0x4   :  { %19 = dma.hbm_to_smem %s17_s14, 16, %s151_s18, [#allocation4]  }
   0x5   :  { %28 = dma.hbm_to_smem %s26_s17, 16, %s152_s19, [#allocation6]  }
   0x6   :  { %145 = dma.done.wait [#allocation4], 16  }
   0x7   :  { %146 = vsyncadd [#allocation4], 4294967280 }
   0x8   :  { %147 = dma.done.wait [#allocation6], 16  }
   0x9   :  { %148 = vsyncadd [#allocation6], 4294967280 }
   0xa   :  { %39 = sfence }
   0xb   :  { %v40_v0 = vld [vmem:[%s190_s2] sm:$0x1]  ;;  %s153_s0 = smov 127   ;;  %s154_s22 = smov 1   ;;  %v41_v1 = vlaneseq }
   0xc   :  { %60 = vrot.lane.b32.xlu0 %v40_v0, %s153_s0  ;;  %s45_s1 = sld [smem:[#allocation2]]  ;;  %s155_s2 = smov [#allocation7]  }
   0xd   :  { %v42_v2 = vand.u32 127, %v41_v1  ;;  %s90_s23 = sld [smem:[#allocation2 + $0x3]]  ;;  %s75_s28 = sshll.u32 %s155_s2, 4  ;;  %s76_s28 = int_to_ptr.vmem [resolvable:$true] %s75_s28 }
   0xe   :  { %s88_s24 = sld [smem:[#allocation2 + $0x1]]  ;;  %s77_s4 = sshll.u32 %s191_s3, 4  ;;  %s78_s4 = int_to_ptr.hbm [resolvable:$true] %s77_s4 }
   0xf   :  { %s89_s25 = sld [smem:[#allocation2 + $0x2]]  ;;  %v43_v3 = vand.u32 1, %v42_v2 }
  0x10   :  { %s49_s26 = sld [smem:[#allocation5]] }
  0x11   :  { %s91_s27 = sld [smem:[#allocation5 + $0x1]]  ;;  %vm44_vm0 = vcmp.eq.s32.totalorder %v43_v3, 0 }
  0x12   :  { %v51_v5 = vstv %s45_s1 }
  0x13   :  { %v52_v6 = vstv %s90_s23 }
  0x14   :  { %62 = vrot.lane.b32.xlu0 %v40_v0, %s154_s22  ;;  %v54_v7 = vstv %s88_s24  ;;  %v53_v9 = vsel %vm44_vm0, %v51_v5, %v52_v6 }
  0x15   :  { %v55_v8 = vstv %s89_s25  ;;  %v65_v11 = vmul.f32 %v53_v9, %v40_v0 }
  0x16   :  { %v56_v10 = vsel %vm44_vm0, %v54_v7, %v55_v8  ;;  %v57_v13 = vstv %s49_s26 }
  0x17   :  { %v58_v14 = vstv %s91_s27 }
  0x18   :  { %v59_v17 = vsel %vm44_vm0, %v57_v13, %v58_v14 }
  0x7e   :  { %v61_v4 = vpop.permute.xlu0 %60 }
  0x86   :  { %v63_v12 = vpop.permute.xlu0 %62 }
  0x87   :  { %v64_v15 = vsel %vm44_vm0, %v61_v4, %v63_v12 }
  0x88   :  { %v66_v16 = vmul.f32 %v64_v15, %v56_v10 }
  0x8a   :  { %v67_v18 = vadd.f32 %v66_v16, %v65_v11 }
  0x8c   :  { %v68_v19 = vadd.f32 %v67_v18, %v59_v17 }
  0x8e   :  { %69 = vst [vmem:[#allocation7] sm:$0x1] %v68_v19 }
  0x8f   :  { %80 = dma.vmem_to_hbm [thread:$0]  %s76_s28, 16, %s78_s4, [#allocation3]  }
  0x90   :  { %149 = dma.done.wait [#allocation3], 16  }
  0x91   :  { %150 = vsyncadd [#allocation3], 4294967280 }
  0x92   :  { %85 = vsyncpa [#allocation3], 1 }
  0x93   :  { %86 = vsyncpa [#allocation4], 1 }
  0x94   :  { %87 = vsyncpa [#allocation6], 1 }

</bundles_post_ra>
